<compile_context>
chip_gen: v5e
topology: v5e:2x2
jax: 0.10.0
libtpu: 0.0.40
codegen_flags: <defaults>
</compile_context>

<pallas_src>
import jax
import jax.numpy as jnp
from jax import lax
from jax.experimental import pallas as pl
from jax.experimental.pallas import tpu as pltpu


def _erf_approx(z):
    """Abramowitz & Stegun 7.1.26 erf approximation, |abs err| <= 1.5e-7.

    Uses only mul/add/div/exp/select so it lowers on every TPU generation.
    """
    a1 = 0.254829592
    a2 = -0.284496736
    a3 = 1.421413741
    a4 = -1.453152027
    a5 = 1.061405429
    p = 0.3275911
    za = jnp.abs(z)
    t = 1.0 / (1.0 + p * za)
    poly = ((((a5 * t + a4) * t + a3) * t + a2) * t + a1) * t
    r = 1.0 - poly * jnp.exp(-za * za)
    return jnp.where(z < 0.0, -r, r)


# ---------------------------------------------------------------------------
# Pallas kernel: full transformer block for ONE batch element.
# ---------------------------------------------------------------------------
def _attention_block_kernel(
    x_ref,          # (S, E)         f32
    ln1_g, ln1_b,   # (1, E)         f32
    wqkv_ref,       # (nh, E, 3*hd)  bf16   per-head [q | k | v] proj (q pre-scaled)
    bqkv_ref,       # (nh, 1, 3*hd)  f32    (q bias pre-scaled)
    wo_ref,         # (nh, hd, E)    bf16   per-head output projection
    bo_ref,         # (1, E)         f32
    ln2_g, ln2_b,   # (1, E)         f32
    w1_ref,         # (E, H)         bf16
    b1_ref,         # (1, H)         f32
    w2_ref,         # (H, E)         bf16
    b2_ref,         # (1, E)         f32
    o_ref,          # (S, E)         f32
):
    f32 = jnp.float32
    bf16 = jnp.bfloat16

    x = x_ref[...]                       # (S, E) f32
    S, E = x.shape
    nh = wqkv_ref.shape[0]
    hd = wqkv_ref.shape[2] // 3
    eps = f32(1e-5)

    # ---- LayerNorm 1 (f32, biased variance, eps=1e-5) ----
    mu = jnp.mean(x, axis=-1, keepdims=True)
    var = jnp.mean((x - mu) * (x - mu), axis=-1, keepdims=True)
    xn1 = (x - mu) * lax.rsqrt(var + eps) * ln1_g[...] + ln1_b[...]

    # ---- Multi-head self-attention: one batched contraction per stage ----
    xb = jnp.broadcast_to(xn1.astype(bf16), (nh, S, E))        # (nh, S, E)
    qkv = jnp.einsum("hse,hef->hsf", xb, wqkv_ref[...],
                     preferred_element_type=f32) + bqkv_ref[...]  # (nh,S,3hd)

    q = qkv[:, :, 0 * hd:1 * hd]                                # already scaled
    k = qkv[:, :, 1 * hd:2 * hd]
    v = qkv[:, :, 2 * hd:3 * hd]

    s = jnp.einsum("hqd,hkd->hqk", q.astype(bf16), k.astype(bf16),
                   preferred_element_type=f32)                  # (nh, S, S)
    s = s - jnp.max(s, axis=-1, keepdims=True)
    p = jnp.exp(s)
    p = p * pl.reciprocal(jnp.sum(p, axis=-1, keepdims=True), approx=True)

    ctx = jnp.einsum("hqk,hkd->hqd", p.astype(bf16), v.astype(bf16),
                     preferred_element_type=f32)                # (nh, S, hd)

    # per-head output projection summed over heads == concat(heads) @ Wo^T
    attn = jnp.einsum("hsd,hde->hse", ctx.astype(bf16), wo_ref[...],
                      preferred_element_type=f32)               # (nh, S, E)
    attn = jnp.sum(attn, axis=0) + bo_ref[...]                  # (S, E)

    x = x + attn                                                # residual 1

    # ---- LayerNorm 2 + MLP (Linear -> exact GELU -> Linear) ----
    mu2 = jnp.mean(x, axis=-1, keepdims=True)
    var2 = jnp.mean((x - mu2) * (x - mu2), axis=-1, keepdims=True)
    xn2 = (x - mu2) * lax.rsqrt(var2 + eps) * ln2_g[...] + ln2_b[...]

    h1 = jnp.dot(xn2.astype(bf16), w1_ref[...],
                 preferred_element_type=f32) + b1_ref[...]      # (S, H)
    inv_sqrt2 = f32(0.7071067811865476)
    h1 = 0.5 * h1 * (1.0 + _erf_approx(h1 * inv_sqrt2))         # exact GELU
    h2 = jnp.dot(h1.astype(bf16), w2_ref[...],
                 preferred_element_type=f32) + b2_ref[...]      # (S, E)

    o_ref[...] = x + h2                                         # residual 2


# ---------------------------------------------------------------------------
# Wrapper
# ---------------------------------------------------------------------------
def attention_block(x, params, *, num_heads):
    """x: (S, B, E) float32 (seq, batch, embed). Returns (S, B, E) float32."""
    S, B, E = x.shape
    H = params["w1"].shape[0]
    assert E % num_heads == 0
    hd = E // num_heads
    # Lane-dense per-batch column blocks of the (S, B*E) view need E % 128 == 0.
    assert E % 128 == 0, "embed_dim must be a multiple of 128 for this kernel"

    f32, bf16 = jnp.float32, jnp.bfloat16

    # Host-side weight prep (one-time): split into per-head groups so every
    # in-kernel matmul is a leading-batch-dim contraction (no in-kernel
    # transposes of activations). PyTorch computes act @ W.T.
    scale = 1.0 / (hd ** 0.5)
    wq, wk, wv = (params["in_proj_w"][i * E:(i + 1) * E] for i in range(3))
    bq, bk, bv = (params["in_proj_b"][i * E:(i + 1) * E] for i in range(3))
    wq = wq * scale                      # fold query scale into weights/bias
    bq = bq * scale

    def per_head_cols(w):                # (E, E) weight -> (nh, E, hd)
        return jnp.transpose(w.T.reshape(E, num_heads, hd), (1, 0, 2))

    wqkv = jnp.concatenate(
        [per_head_cols(wq), per_head_cols(wk), per_head_cols(wv)],
        axis=-1).astype(bf16)                                    # (nh, E, 3hd)
    bqkv = jnp.concatenate(
        [bq.reshape(num_heads, 1, hd), bk.reshape(num_heads, 1, hd),
         bv.reshape(num_heads, 1, hd)], axis=-1).astype(f32)     # (nh, 1, 3hd)
    wo = params["out_proj_w"].T.reshape(num_heads, hd, E).astype(bf16)

    inputs = [
        x.reshape(S, B * E),                     # free reshape, no transpose
        params["ln1_g"].reshape(1, E).astype(f32),
        params["ln1_b"].reshape(1, E).astype(f32),
        wqkv, bqkv, wo,
        params["out_proj_b"].reshape(1, E).astype(f32),
        params["ln2_g"].reshape(1, E).astype(f32),
        params["ln2_b"].reshape(1, E).astype(f32),
        params["w1"].T.astype(bf16),             # (E, H)
        params["b1"].reshape(1, H).astype(f32),
        params["w2"].T.astype(bf16),             # (H, E)
        params["b2"].reshape(1, E).astype(f32),
    ]

    def const_spec(a):       # whole array, constant block index -> resident
        zeros = (0,) * a.ndim
        return pl.BlockSpec(a.shape, lambda b, _z=zeros: _z)

    in_specs = [pl.BlockSpec((S, E), lambda b: (0, b))] + [
        const_spec(a) for a in inputs[1:]
    ]

    out = pl.pallas_call(
        _attention_block_kernel,
        out_shape=jax.ShapeDtypeStruct((S, B * E), f32),
        grid_spec=pltpu.PrefetchScalarGridSpec(
            num_scalar_prefetch=0,
            grid=(B,),
            in_specs=in_specs,
            out_specs=pl.BlockSpec((S, E), lambda b: (0, b)),
        ),
        compiler_params=pltpu.CompilerParams(
            dimension_semantics=("parallel",),
            vmem_limit_bytes=32 * 1024 * 1024,
        ),
    )(*inputs)

    return out.reshape(S, B, E)                  # free reshape back


# ---------------------------------------------------------------------------
# Pure-JAX f32 reference (same math) for a correctness check
# ---------------------------------------------------------------------------
def _reference(x, p, *, num_heads):
    S, B, E = x.shape
    eps = 1e-5

    def ln(v, g, b):
        mu = jnp.mean(v, axis=-1, keepdims=True)
        var = jnp.mean((v - mu) ** 2, axis=-1, keepdims=True)
        return (v - mu) / jnp.sqrt(var + eps) * g + b

    inp = ln(x, p["ln1_g"], p["ln1_b"])
    qkv = jnp.einsum("sbe,fe->sbf", inp, p["in_proj_w"]) + p["in_proj_b"]
    q, k, v = jnp.split(qkv, 3, axis=-1)
    hd = E // num_heads

    def heads(t):  # (S,B,E) -> (B,nh,S,hd)
        return jnp.transpose(t.reshape(S, B, num_heads, hd), (1, 2, 0, 3))

    qh, kh, vh = heads(q) / jnp.sqrt(hd), heads(k), heads(v)
    s = jnp.einsum("bhqd,bhkd->bhqk", qh, kh)
    pr = jax.nn.softmax(s, axis=-1)
    o = jnp.einsum("bhqk,bhkd->bhqd", pr, vh)
    o = jnp.transpose(o, (2, 0, 1, 3)).reshape(S, B, E)
    o = jnp.einsum("sbe,fe->sbf", o, p["out_proj_w"]) + p["out_proj_b"]
    x = x + o
    h = ln(x, p["ln2_g"], p["ln2_b"])
    h = jnp.einsum("sbe,he->sbh", h, p["w1"]) + p["b1"]
    h = jax.nn.gelu(h, approximate=False)
    h = jnp.einsum("sbh,eh->sbe", h, p["w2"]) + p["b2"]
    return x + h


# ---------------------------------------------------------------------------
if __name__ == "__main__":
    S, B, E, H, NH = 8, 2, 128, 256, 4   # seq, batch, embed, mlp hidden, heads

    key = jax.random.PRNGKey(0)
    ks = jax.random.split(key, 13)
    scale = 0.05
    params = {
        "ln1_g": 1.0 + 0.1 * jax.random.normal(ks[8], (E,), jnp.float32),
        "ln1_b": 0.1 * jax.random.normal(ks[9], (E,), jnp.float32),
        "in_proj_w": scale * jax.random.normal(ks[0], (3 * E, E), jnp.float32),
        "in_proj_b": scale * jax.random.normal(ks[1], (3 * E,), jnp.float32),
        "out_proj_w": scale * jax.random.normal(ks[2], (E, E), jnp.float32),
        "out_proj_b": scale * jax.random.normal(ks[3], (E,), jnp.float32),
        "ln2_g": 1.0 + 0.1 * jax.random.normal(ks[10], (E,), jnp.float32),
        "ln2_b": 0.1 * jax.random.normal(ks[11], (E,), jnp.float32),
        "w1": scale * jax.random.normal(ks[4], (H, E), jnp.float32),
        "b1": scale * jax.random.normal(ks[5], (H,), jnp.float32),
        "w2": scale * jax.random.normal(ks[6], (E, H), jnp.float32),
        "b2": scale * jax.random.normal(ks[7], (E,), jnp.float32),
    }

    x = jax.random.normal(ks[12], (S, B, E), jnp.float32)

    out = jax.block_until_ready(attention_block(x, params, num_heads=NH))
    ref = jax.block_until_ready(_reference(x, params, num_heads=NH))

    assert out.shape == (S, B, E)
    # bf16 matmul operands (f32 accumulation) + approx reciprocal loosen the
    # tolerance relative to the pure-f32 reference.
    assert jnp.allclose(out, ref, atol=3e-2, rtol=3e-2), "mismatch vs reference"

    print("KERNEL_OK")
</pallas_src>

<mosaic_0001>
module attributes {stable_mosaic.version = 11 : i64} {
  func.func @_attention_block_kernel(%arg0: i32, %arg1: memref<8x128xf32, #tpu.memory_space<vmem>>, %arg2: memref<1x128xf32, #tpu.memory_space<vmem>>, %arg3: memref<1x128xf32, #tpu.memory_space<vmem>>, %arg4: memref<4x128x96xbf16, #tpu.memory_space<vmem>>, %arg5: memref<4x1x96xf32, #tpu.memory_space<vmem>>, %arg6: memref<4x32x128xbf16, #tpu.memory_space<vmem>>, %arg7: memref<1x128xf32, #tpu.memory_space<vmem>>, %arg8: memref<1x128xf32, #tpu.memory_space<vmem>>, %arg9: memref<1x128xf32, #tpu.memory_space<vmem>>, %arg10: memref<128x256xbf16, #tpu.memory_space<vmem>>, %arg11: memref<1x256xf32, #tpu.memory_space<vmem>>, %arg12: memref<256x128xbf16, #tpu.memory_space<vmem>>, %arg13: memref<1x128xf32, #tpu.memory_space<vmem>>, %arg14: memref<8x128xf32, #tpu.memory_space<vmem>>) attributes {dimension_semantics = [#tpu.dimension_semantics<parallel>], iteration_bounds = array<i64: 2>, scalar_prefetch = 0 : i64, scratch_operands = 0 : i64, tpu.core_type = #tpu.core_type<tc>, window_params = [{transform_indices = @transform_0, window_bounds = array<i64: 8, 128>}, {pipeline_mode = #tpu.pipeline_mode<synchronous>, transform_indices = @transform_1, window_bounds = array<i64: 1, 128>}, {pipeline_mode = #tpu.pipeline_mode<synchronous>, transform_indices = @transform_2, window_bounds = array<i64: 1, 128>}, {pipeline_mode = #tpu.pipeline_mode<synchronous>, transform_indices = @transform_3, window_bounds = array<i64: 4, 128, 96>}, {pipeline_mode = #tpu.pipeline_mode<synchronous>, transform_indices = @transform_4, window_bounds = array<i64: 4, 1, 96>}, {pipeline_mode = #tpu.pipeline_mode<synchronous>, transform_indices = @transform_5, window_bounds = array<i64: 4, 32, 128>}, {pipeline_mode = #tpu.pipeline_mode<synchronous>, transform_indices = @transform_6, window_bounds = array<i64: 1, 128>}, {pipeline_mode = #tpu.pipeline_mode<synchronous>, transform_indices = @transform_7, window_bounds = array<i64: 1, 128>}, {pipeline_mode = #tpu.pipeline_mode<synchronous>, transform_indices = @transform_8, window_bounds = array<i64: 1, 128>}, {pipeline_mode = #tpu.pipeline_mode<synchronous>, transform_indices = @transform_9, window_bounds = array<i64: 128, 256>}, {pipeline_mode = #tpu.pipeline_mode<synchronous>, transform_indices = @transform_10, window_bounds = array<i64: 1, 256>}, {pipeline_mode = #tpu.pipeline_mode<synchronous>, transform_indices = @transform_11, window_bounds = array<i64: 256, 128>}, {pipeline_mode = #tpu.pipeline_mode<synchronous>, transform_indices = @transform_12, window_bounds = array<i64: 1, 128>}, {transform_indices = @transform_13, window_bounds = array<i64: 8, 128>}]} {
    %c0 = arith.constant 0 : index
    %c0_0 = arith.constant 0 : index
    %0 = vector.load %arg1[%c0, %c0_0] : memref<8x128xf32, #tpu.memory_space<vmem>>, vector<8x128xf32>
    %cst = arith.constant dense<0.000000e+00> : vector<8xf32>
    %1 = vector.multi_reduction <add>, %0, %cst [1] : vector<8x128xf32> to vector<8xf32>
    %2 = vector.shape_cast %1 : vector<8xf32> to vector<8x1xf32>
    %cst_1 = arith.constant 1.280000e+02 : f32
    %3 = vector.broadcast %cst_1 : f32 to vector<8x1xf32>
    %4 = arith.divf %2, %3 : vector<8x1xf32>
    %5 = vector.broadcast %4 : vector<8x1xf32> to vector<8x128xf32>
    %6 = arith.subf %0, %5 : vector<8x128xf32>
    %7 = vector.broadcast %4 : vector<8x1xf32> to vector<8x128xf32>
    %8 = arith.subf %0, %7 : vector<8x128xf32>
    %9 = arith.mulf %6, %8 : vector<8x128xf32>
    %cst_2 = arith.constant dense<0.000000e+00> : vector<8xf32>
    %10 = vector.multi_reduction <add>, %9, %cst_2 [1] : vector<8x128xf32> to vector<8xf32>
    %11 = vector.shape_cast %10 : vector<8xf32> to vector<8x1xf32>
    %cst_3 = arith.constant 1.280000e+02 : f32
    %12 = vector.broadcast %cst_3 : f32 to vector<8x1xf32>
    %13 = arith.divf %11, %12 : vector<8x1xf32>
    %14 = vector.broadcast %4 : vector<8x1xf32> to vector<8x128xf32>
    %15 = arith.subf %0, %14 : vector<8x128xf32>
    %cst_4 = arith.constant 9.99999974E-6 : f32
    %16 = vector.broadcast %cst_4 : f32 to vector<8x1xf32>
    %17 = arith.addf %13, %16 : vector<8x1xf32>
    %18 = math.rsqrt %17 : vector<8x1xf32>
    %19 = vector.broadcast %18 : vector<8x1xf32> to vector<8x128xf32>
    %20 = arith.mulf %15, %19 : vector<8x128xf32>
    %c0_5 = arith.constant 0 : index
    %c0_6 = arith.constant 0 : index
    %21 = vector.load %arg2[%c0_5, %c0_6] : memref<1x128xf32, #tpu.memory_space<vmem>>, vector<1x128xf32>
    %22 = vector.broadcast %21 : vector<1x128xf32> to vector<8x128xf32>
    %23 = arith.mulf %20, %22 : vector<8x128xf32>
    %c0_7 = arith.constant 0 : index
    %c0_8 = arith.constant 0 : index
    %24 = vector.load %arg3[%c0_7, %c0_8] : memref<1x128xf32, #tpu.memory_space<vmem>>, vector<1x128xf32>
    %25 = vector.broadcast %24 : vector<1x128xf32> to vector<8x128xf32>
    %26 = arith.addf %23, %25 : vector<8x128xf32>
    %27 = arith.truncf %26 : vector<8x128xf32> to vector<8x128xbf16>
    %28 = vector.shape_cast %27 : vector<8x128xbf16> to vector<1x8x128xbf16>
    %29 = vector.broadcast %28 : vector<1x8x128xbf16> to vector<4x8x128xbf16>
    %c0_9 = arith.constant 0 : index
    %c0_10 = arith.constant 0 : index
    %c0_11 = arith.constant 0 : index
    %30 = vector.load %arg4[%c0_9, %c0_10, %c0_11] : memref<4x128x96xbf16, #tpu.memory_space<vmem>>, vector<4x128x96xbf16>
    "tpu.trace_start"() <{level = 10 : i32, message = "hse,hef->hsf"}> : () -> ()
    %cst_12 = arith.constant dense<0.000000e+00> : vector<4x8x96xf32>
    %31 = tpu.matmul %29, %30, %cst_12 {dimension_numbers = #tpu.dot_dimension_numbers<[2], [1], [1], [2], [0, 0, 0, 1, 1, 2], [0], [0]>} : vector<4x8x128xbf16>, vector<4x128x96xbf16>, vector<4x8x96xf32> -> vector<4x8x96xf32>
    "tpu.trace_stop"() : () -> ()
    %c0_13 = arith.constant 0 : index
    %c0_14 = arith.constant 0 : index
    %c0_15 = arith.constant 0 : index
    %32 = vector.load %arg5[%c0_13, %c0_14, %c0_15] : memref<4x1x96xf32, #tpu.memory_space<vmem>>, vector<4x1x96xf32>
    %33 = vector.broadcast %32 : vector<4x1x96xf32> to vector<4x8x96xf32>
    %34 = arith.addf %31, %33 : vector<4x8x96xf32>
    %35 = vector.extract_strided_slice %34 {offsets = [0, 0, 0], sizes = [4, 8, 32], strides = [1, 1, 1]} : vector<4x8x96xf32> to vector<4x8x32xf32>
    %36 = vector.extract_strided_slice %34 {offsets = [0, 0, 32], sizes = [4, 8, 32], strides = [1, 1, 1]} : vector<4x8x96xf32> to vector<4x8x32xf32>
    %37 = vector.extract_strided_slice %34 {offsets = [0, 0, 64], sizes = [4, 8, 32], strides = [1, 1, 1]} : vector<4x8x96xf32> to vector<4x8x32xf32>
    %38 = arith.truncf %35 : vector<4x8x32xf32> to vector<4x8x32xbf16>
    %39 = arith.truncf %36 : vector<4x8x32xf32> to vector<4x8x32xbf16>
    "tpu.trace_start"() <{level = 10 : i32, message = "hqd,hkd->hqk"}> : () -> ()
    %cst_16 = arith.constant dense<0.000000e+00> : vector<4x8x8xf32>
    %40 = tpu.matmul %38, %39, %cst_16 {dimension_numbers = #tpu.dot_dimension_numbers<[2], [2], [1], [1], [0, 0, 0, 1, 1, 1], [0], [0]>} : vector<4x8x32xbf16>, vector<4x8x32xbf16>, vector<4x8x8xf32> -> vector<4x8x8xf32>
    "tpu.trace_stop"() : () -> ()
    %cst_17 = arith.constant dense<0xFF800000> : vector<4x8xf32>
    %41 = vector.multi_reduction <maximumf>, %40, %cst_17 [2] : vector<4x8x8xf32> to vector<4x8xf32>
    %42 = vector.shape_cast %41 : vector<4x8xf32> to vector<4x8x1xf32>
    %43 = vector.broadcast %42 : vector<4x8x1xf32> to vector<4x8x8xf32>
    %44 = arith.subf %40, %43 : vector<4x8x8xf32>
    %45 = math.exp %44 : vector<4x8x8xf32>
    %cst_18 = arith.constant dense<0.000000e+00> : vector<4x8xf32>
    %46 = vector.multi_reduction <add>, %45, %cst_18 [2] : vector<4x8x8xf32> to vector<4x8xf32>
    %47 = vector.shape_cast %46 : vector<4x8xf32> to vector<4x8x1xf32>
    %48 = tpu.reciprocal %47 {approx = true} : vector<4x8x1xf32> -> vector<4x8x1xf32>
    %49 = vector.broadcast %48 : vector<4x8x1xf32> to vector<4x8x8xf32>
    %50 = arith.mulf %45, %49 : vector<4x8x8xf32>
    %51 = arith.truncf %50 : vector<4x8x8xf32> to vector<4x8x8xbf16>
    %52 = arith.truncf %37 : vector<4x8x32xf32> to vector<4x8x32xbf16>
    "tpu.trace_start"() <{level = 10 : i32, message = "hqk,hkd->hqd"}> : () -> ()
    %cst_19 = arith.constant dense<0.000000e+00> : vector<4x8x32xf32>
    %53 = tpu.matmul %51, %52, %cst_19 {dimension_numbers = #tpu.dot_dimension_numbers<[2], [1], [1], [2], [0, 0, 0, 1, 1, 2], [0], [0]>} : vector<4x8x8xbf16>, vector<4x8x32xbf16>, vector<4x8x32xf32> -> vector<4x8x32xf32>
    "tpu.trace_stop"() : () -> ()
    %54 = arith.truncf %53 : vector<4x8x32xf32> to vector<4x8x32xbf16>
    %c0_20 = arith.constant 0 : index
    %c0_21 = arith.constant 0 : index
    %c0_22 = arith.constant 0 : index
    %55 = vector.load %arg6[%c0_20, %c0_21, %c0_22] : memref<4x32x128xbf16, #tpu.memory_space<vmem>>, vector<4x32x128xbf16>
    "tpu.trace_start"() <{level = 10 : i32, message = "hsd,hde->hse"}> : () -> ()
    %cst_23 = arith.constant dense<0.000000e+00> : vector<4x8x128xf32>
    %56 = tpu.matmul %54, %55, %cst_23 {dimension_numbers = #tpu.dot_dimension_numbers<[2], [1], [1], [2], [0, 0, 0, 1, 1, 2], [0], [0]>} : vector<4x8x32xbf16>, vector<4x32x128xbf16>, vector<4x8x128xf32> -> vector<4x8x128xf32>
    "tpu.trace_stop"() : () -> ()
    %cst_24 = arith.constant dense<0.000000e+00> : vector<8x128xf32>
    %57 = vector.multi_reduction <add>, %56, %cst_24 [0] : vector<4x8x128xf32> to vector<8x128xf32>
    %c0_25 = arith.constant 0 : index
    %c0_26 = arith.constant 0 : index
    %58 = vector.load %arg7[%c0_25, %c0_26] : memref<1x128xf32, #tpu.memory_space<vmem>>, vector<1x128xf32>
    %59 = vector.broadcast %58 : vector<1x128xf32> to vector<8x128xf32>
    %60 = arith.addf %57, %59 : vector<8x128xf32>
    %61 = arith.addf %0, %60 : vector<8x128xf32>
    %cst_27 = arith.constant dense<0.000000e+00> : vector<8xf32>
    %62 = vector.multi_reduction <add>, %61, %cst_27 [1] : vector<8x128xf32> to vector<8xf32>
    %63 = vector.shape_cast %62 : vector<8xf32> to vector<8x1xf32>
    %cst_28 = arith.constant 1.280000e+02 : f32
    %64 = vector.broadcast %cst_28 : f32 to vector<8x1xf32>
    %65 = arith.divf %63, %64 : vector<8x1xf32>
    %66 = vector.broadcast %65 : vector<8x1xf32> to vector<8x128xf32>
    %67 = arith.subf %61, %66 : vector<8x128xf32>
    %68 = vector.broadcast %65 : vector<8x1xf32> to vector<8x128xf32>
    %69 = arith.subf %61, %68 : vector<8x128xf32>
    %70 = arith.mulf %67, %69 : vector<8x128xf32>
    %cst_29 = arith.constant dense<0.000000e+00> : vector<8xf32>
    %71 = vector.multi_reduction <add>, %70, %cst_29 [1] : vector<8x128xf32> to vector<8xf32>
    %72 = vector.shape_cast %71 : vector<8xf32> to vector<8x1xf32>
    %cst_30 = arith.constant 1.280000e+02 : f32
    %73 = vector.broadcast %cst_30 : f32 to vector<8x1xf32>
    %74 = arith.divf %72, %73 : vector<8x1xf32>
    %75 = vector.broadcast %65 : vector<8x1xf32> to vector<8x128xf32>
    %76 = arith.subf %61, %75 : vector<8x128xf32>
    %cst_31 = arith.constant 9.99999974E-6 : f32
    %77 = vector.broadcast %cst_31 : f32 to vector<8x1xf32>
    %78 = arith.addf %74, %77 : vector<8x1xf32>
    %79 = math.rsqrt %78 : vector<8x1xf32>
    %80 = vector.broadcast %79 : vector<8x1xf32> to vector<8x128xf32>
    %81 = arith.mulf %76, %80 : vector<8x128xf32>
    %c0_32 = arith.constant 0 : index
    %c0_33 = arith.constant 0 : index
    %82 = vector.load %arg8[%c0_32, %c0_33] : memref<1x128xf32, #tpu.memory_space<vmem>>, vector<1x128xf32>
    %83 = vector.broadcast %82 : vector<1x128xf32> to vector<8x128xf32>
    %84 = arith.mulf %81, %83 : vector<8x128xf32>
    %c0_34 = arith.constant 0 : index
    %c0_35 = arith.constant 0 : index
    %85 = vector.load %arg9[%c0_34, %c0_35] : memref<1x128xf32, #tpu.memory_space<vmem>>, vector<1x128xf32>
    %86 = vector.broadcast %85 : vector<1x128xf32> to vector<8x128xf32>
    %87 = arith.addf %84, %86 : vector<8x128xf32>
    %88 = arith.truncf %87 : vector<8x128xf32> to vector<8x128xbf16>
    %c0_36 = arith.constant 0 : index
    %c0_37 = arith.constant 0 : index
    %89 = vector.load %arg10[%c0_36, %c0_37] : memref<128x256xbf16, #tpu.memory_space<vmem>>, vector<128x256xbf16>
    %cst_38 = arith.constant dense<0.000000e+00> : vector<8x256xf32>
    %90 = tpu.matmul %88, %89, %cst_38 {dimension_numbers = #tpu.dot_dimension_numbers<[1], [0], [0], [1], [0, 0, 1, 1], [], []>} : vector<8x128xbf16>, vector<128x256xbf16>, vector<8x256xf32> -> vector<8x256xf32>
    %c0_39 = arith.constant 0 : index
    %c0_40 = arith.constant 0 : index
    %91 = vector.load %arg11[%c0_39, %c0_40] : memref<1x256xf32, #tpu.memory_space<vmem>>, vector<1x256xf32>
    %92 = vector.broadcast %91 : vector<1x256xf32> to vector<8x256xf32>
    %93 = arith.addf %90, %92 : vector<8x256xf32>
    %cst_41 = arith.constant 5.000000e-01 : f32
    %94 = vector.broadcast %cst_41 : f32 to vector<8x256xf32>
    %95 = arith.mulf %94, %93 : vector<8x256xf32>
    %cst_42 = arith.constant 0.707106769 : f32
    %96 = vector.broadcast %cst_42 : f32 to vector<8x256xf32>
    %97 = arith.mulf %93, %96 : vector<8x256xf32>
    %98 = math.absf %97 : vector<8x256xf32>
    %cst_43 = arith.constant 0.327591091 : f32
    %99 = vector.broadcast %cst_43 : f32 to vector<8x256xf32>
    %100 = arith.mulf %99, %98 : vector<8x256xf32>
    %cst_44 = arith.constant 1.000000e+00 : f32
    %101 = vector.broadcast %cst_44 : f32 to vector<8x256xf32>
    %102 = arith.addf %101, %100 : vector<8x256xf32>
    %cst_45 = arith.constant 1.000000e+00 : f32
    %103 = vector.broadcast %cst_45 : f32 to vector<8x256xf32>
    %104 = arith.divf %103, %102 : vector<8x256xf32>
    %cst_46 = arith.constant 1.06140542 : f32
    %105 = vector.broadcast %cst_46 : f32 to vector<8x256xf32>
    %106 = arith.mulf %105, %104 : vector<8x256xf32>
    %cst_47 = arith.constant -1.45315206 : f32
    %107 = vector.broadcast %cst_47 : f32 to vector<8x256xf32>
    %108 = arith.addf %106, %107 : vector<8x256xf32>
    %109 = arith.mulf %108, %104 : vector<8x256xf32>
    %cst_48 = arith.constant 1.42141378 : f32
    %110 = vector.broadcast %cst_48 : f32 to vector<8x256xf32>
    %111 = arith.addf %109, %110 : vector<8x256xf32>
    %112 = arith.mulf %111, %104 : vector<8x256xf32>
    %cst_49 = arith.constant -0.284496725 : f32
    %113 = vector.broadcast %cst_49 : f32 to vector<8x256xf32>
    %114 = arith.addf %112, %113 : vector<8x256xf32>
    %115 = arith.mulf %114, %104 : vector<8x256xf32>
    %cst_50 = arith.constant 0.254829586 : f32
    %116 = vector.broadcast %cst_50 : f32 to vector<8x256xf32>
    %117 = arith.addf %115, %116 : vector<8x256xf32>
    %118 = arith.mulf %117, %104 : vector<8x256xf32>
    %cst_51 = arith.constant 0.000000e+00 : f32
    %119 = vector.broadcast %cst_51 : f32 to vector<8x256xf32>
    %120 = arith.subf %119, %98 : vector<8x256xf32>
    %121 = arith.mulf %120, %98 : vector<8x256xf32>
    %122 = math.exp %121 : vector<8x256xf32>
    %123 = arith.mulf %118, %122 : vector<8x256xf32>
    %cst_52 = arith.constant 1.000000e+00 : f32
    %124 = vector.broadcast %cst_52 : f32 to vector<8x256xf32>
    %125 = arith.subf %124, %123 : vector<8x256xf32>
    %cst_53 = arith.constant 0.000000e+00 : f32
    %126 = vector.broadcast %cst_53 : f32 to vector<8x256xf32>
    %127 = arith.cmpf olt, %97, %126 : vector<8x256xf32>
    %cst_54 = arith.constant 0.000000e+00 : f32
    %128 = vector.broadcast %cst_54 : f32 to vector<8x256xf32>
    %129 = arith.subf %128, %125 : vector<8x256xf32>
    %130 = arith.select %127, %129, %125 : vector<8x256xi1>, vector<8x256xf32>
    %cst_55 = arith.constant 1.000000e+00 : f32
    %131 = vector.broadcast %cst_55 : f32 to vector<8x256xf32>
    %132 = arith.addf %131, %130 : vector<8x256xf32>
    %133 = arith.mulf %95, %132 : vector<8x256xf32>
    %134 = arith.truncf %133 : vector<8x256xf32> to vector<8x256xbf16>
    %c0_56 = arith.constant 0 : index
    %c0_57 = arith.constant 0 : index
    %135 = vector.load %arg12[%c0_56, %c0_57] : memref<256x128xbf16, #tpu.memory_space<vmem>>, vector<256x128xbf16>
    %cst_58 = arith.constant dense<0.000000e+00> : vector<8x128xf32>
    %136 = tpu.matmul %134, %135, %cst_58 {dimension_numbers = #tpu.dot_dimension_numbers<[1], [0], [0], [1], [0, 0, 1, 1], [], []>} : vector<8x256xbf16>, vector<256x128xbf16>, vector<8x128xf32> -> vector<8x128xf32>
    %c0_59 = arith.constant 0 : index
    %c0_60 = arith.constant 0 : index
    %137 = vector.load %arg13[%c0_59, %c0_60] : memref<1x128xf32, #tpu.memory_space<vmem>>, vector<1x128xf32>
    %138 = vector.broadcast %137 : vector<1x128xf32> to vector<8x128xf32>
    %139 = arith.addf %136, %138 : vector<8x128xf32>
    %140 = arith.addf %61, %139 : vector<8x128xf32>
    %c0_61 = arith.constant 0 : index
    %c0_62 = arith.constant 0 : index
    %141 = vector.load %arg14[%c0_61, %c0_62] : memref<8x128xf32, #tpu.memory_space<vmem>>, vector<8x128xf32>
    tpu.vector_store %arg14[%c0_61, %c0_62], %140 {strides = array<i32>} : memref<8x128xf32, #tpu.memory_space<vmem>>, vector<8x128xf32>,
    return
  }
  func.func @transform_0(%arg0: i32) -> (i32, i32) {
    %c0_i32 = arith.constant 0 : i32
    %c0_i32_0 = arith.constant 0 : i32
    return %c0_i32, %arg0 : i32, i32
  }
  func.func @transform_1(%arg0: i32) -> (i32, i32) {
    %c0_i32 = arith.constant 0 : i32
    %c0_i32_0 = arith.constant 0 : i32
    %c0_i32_1 = arith.constant 0 : i32
    return %c0_i32, %c0_i32_0 : i32, i32
  }
  func.func @transform_2(%arg0: i32) -> (i32, i32) {
    %c0_i32 = arith.constant 0 : i32
    %c0_i32_0 = arith.constant 0 : i32
    %c0_i32_1 = arith.constant 0 : i32
    return %c0_i32, %c0_i32_0 : i32, i32
  }
  func.func @transform_3(%arg0: i32) -> (i32, i32, i32) {
    %c0_i32 = arith.constant 0 : i32
    %c0_i32_0 = arith.constant 0 : i32
    %c0_i32_1 = arith.constant 0 : i32
    %c0_i32_2 = arith.constant 0 : i32
    return %c0_i32, %c0_i32_0, %c0_i32_1 : i32, i32, i32
  }
  func.func @transform_4(%arg0: i32) -> (i32, i32, i32) {
    %c0_i32 = arith.constant 0 : i32
    %c0_i32_0 = arith.constant 0 : i32
    %c0_i32_1 = arith.constant 0 : i32
    %c0_i32_2 = arith.constant 0 : i32
    return %c0_i32, %c0_i32_0, %c0_i32_1 : i32, i32, i32
  }
  func.func @transform_5(%arg0: i32) -> (i32, i32, i32) {
    %c0_i32 = arith.constant 0 : i32
    %c0_i32_0 = arith.constant 0 : i32
    %c0_i32_1 = arith.constant 0 : i32
    %c0_i32_2 = arith.constant 0 : i32
    return %c0_i32, %c0_i32_0, %c0_i32_1 : i32, i32, i32
  }
  func.func @transform_6(%arg0: i32) -> (i32, i32) {
    %c0_i32 = arith.constant 0 : i32
    %c0_i32_0 = arith.constant 0 : i32
    %c0_i32_1 = arith.constant 0 : i32
    return %c0_i32, %c0_i32_0 : i32, i32
  }
  func.func @transform_7(%arg0: i32) -> (i32, i32) {
    %c0_i32 = arith.constant 0 : i32
    %c0_i32_0 = arith.constant 0 : i32
    %c0_i32_1 = arith.constant 0 : i32
    return %c0_i32, %c0_i32_0 : i32, i32
  }
  func.func @transform_8(%arg0: i32) -> (i32, i32) {
    %c0_i32 = arith.constant 0 : i32
    %c0_i32_0 = arith.constant 0 : i32
    %c0_i32_1 = arith.constant 0 : i32
    return %c0_i32, %c0_i32_0 : i32, i32
  }
  func.func @transform_9(%arg0: i32) -> (i32, i32) {
    %c0_i32 = arith.constant 0 : i32
    %c0_i32_0 = arith.constant 0 : i32
    %c0_i32_1 = arith.constant 0 : i32
    return %c0_i32, %c0_i32_0 : i32, i32
  }
  func.func @transform_10(%arg0: i32) -> (i32, i32) {
    %c0_i32 = arith.constant 0 : i32
    %c0_i32_0 = arith.constant 0 : i32
    %c0_i32_1 = arith.constant 0 : i32
    return %c0_i32, %c0_i32_0 : i32, i32
  }
  func.func @transform_11(%arg0: i32) -> (i32, i32) {
    %c0_i32 = arith.constant 0 : i32
    %c0_i32_0 = arith.constant 0 : i32
    %c0_i32_1 = arith.constant 0 : i32
    return %c0_i32, %c0_i32_0 : i32, i32
  }
  func.func @transform_12(%arg0: i32) -> (i32, i32) {
    %c0_i32 = arith.constant 0 : i32
    %c0_i32_0 = arith.constant 0 : i32
    %c0_i32_1 = arith.constant 0 : i32
    return %c0_i32, %c0_i32_0 : i32, i32
  }
  func.func @transform_13(%arg0: i32) -> (i32, i32) {
    %c0_i32 = arith.constant 0 : i32
    %c0_i32_0 = arith.constant 0 : i32
    return %c0_i32, %arg0 : i32, i32
  }
}

</mosaic_0001>

<bundles_post_ra>
// kernel: tpu_custom_call.1
= control target key start
LH: loop header
LB: loop body
LE: loop exit
PB: predicated region body
PF: predicated region fallthrough
CT: control target
= control target key end

     0   :  { %s2727_s0 = inlined_call_operand.vmem [shape: f32[8,256], index: 0, kind: input, shape index: {}]   ;;  %s2728_s1 = inlined_call_operand.vmem [shape: f32[1,128], index: 1, kind: input, shape index: {}]   ;;  %s2729_s2 = inlined_call_operand.vmem [shape: f32[1,128], index: 2, kind: input, shape index: {}]   ;;  %s2730_s3 = inlined_call_operand.vmem [shape: bf16[4,128,96], index: 3, kind: input, shape index: {}]   ;;  %s2731_s4 = inlined_call_operand.vmem [shape: f32[4,1,96], index: 4, kind: input, shape index: {}]   ;;  %s2732_s5 = inlined_call_operand.vmem [shape: bf16[4,32,128], index: 5, kind: input, shape index: {}]   ;;  %s2733_s6 = inlined_call_operand.vmem [shape: f32[1,128], index: 6, kind: input, shape index: {}]   ;;  %s2734_s7 = inlined_call_operand.vmem [shape: f32[1,128], index: 7, kind: input, shape index: {}]   ;;  %s2735_s8 = inlined_call_operand.vmem [shape: f32[1,128], index: 8, kind: input, shape index: {}]   ;;  %s2736_s9 = inlined_call_operand.vmem [shape: bf16[128,256], index: 9, kind: input, shape index: {}]   ;;  %s2737_s10 = inlined_call_operand.vmem [shape: f32[1,256], index: 10, kind: input, shape index: {}]   ;;  %s2738_s11 = inlined_call_operand.vmem [shape: bf16[256,128], index: 11, kind: input, shape index: {}]   ;;  %s2739_s12 = inlined_call_operand.vmem [shape: f32[1,128], index: 12, kind: input, shape index: {}]   ;;  %s2740_s13 = inlined_call_operand.hbm [shape: f32[8,256], index: 13, kind: output, shape index: {}]  }
   0x1   :  { %2742 = sst [smem:[#allocation7_spill]] %s2727_s0 }
   0x2   :  { %18 = vsyncpa [#allocation3], 0 }
   0x3   :  { %20 = vsyncpa [#allocation3 + $0x1], 0  ;;  %s2253_s25 = smov 0   ;;  %s2255_s26 = smov 0  }
   0x4   :  { %s2257_s27 = smov 0   ;;  %s2259_s28 = smov 0  }
   0x5 LB: > { %2743 = sst [smem:[#allocation5_spill]] %s2174_s27  ;;  %s2274_s29 = sadd.s32 4294967295, %s2178_s28   ;;  %s2178_s28 = sphi %s2259_s28, %s2752_s28   ;;  %s2174_s27 = sphi %s2257_s27, %s2749_s27   ;;  %s2170_s26 = sphi %s2255_s26, %s2751_s26   ;;  %s2166_s25 = sphi %s2253_s25, %s2750_s25  }
   0x6   : > { %s1652_s30 = sadd.s32 4294967294, %s2178_s28   ;;  %s2278_s14 = sadd.s32 1, %s2178_s28  }
   0x7   : > { %s311_s15 = sadd.s32 1, %s2174_s27  ;;  %s308_s16 = ssub.s32 %s2178_s28, %s2278_s14 }
   0x8   : > { %p321_p0 = scmp.ne.s32.totalorder %s2174_s27, %s2170_s26  ;;  %p309_p1 = scmp.eq.s32.totalorder %s308_s16, 0 }
   0x9   : > { %p322_p2 = scmp.eq.s32.totalorder %s2274_s29, 1  ;;  %p327_p3 = scmp.ne.s32.totalorder %s2170_s26, %s2166_s25 }
   0xa   : > { %p328_p4 = scmp.eq.s32.totalorder %s1652_s30, 1  ;;  %p1655_p7 = scmp.ge.s32.totalorder %s2178_s28, 1 }
   0xb   : > { %s2289_s17 = scalar_select %p309_p1, %s2174_s27, %s311_s15  }
   0xc   : > { %p2291_p5 = por %p322_p2, %p321_p0  ;;  %p2295_p6 = por %p328_p4, %p327_p3 }
   0xd   : > { %2744 = sst [smem:[#allocation6_spill]] %s2289_s17  ;;  %p389_p8 = scmp.lt.s32.totalorder %s2178_s28, 3 }
   0xf   : > { %p390_p9 = pnand %p1655_p7, %p389_p8 }
  0x10   : > { %p432_p10 = scmp.lt.s32.totalorder (!%p390_p9), %s2274_s29, 1  ;;  %s2747_s0 = sld [smem:[#allocation7_spill]] (!%p390_p9) }
  0x11   : > { %393 = sbr.rel (%p390_p9) target bundleno = 1831 (0x727), region = 72  ;;  %s2181_s22 = smov (!%p390_p9), 96  }
  0x12   : > { %s429_s27 = sand.u32 (!%p390_p9), 1, %s2170_s26   ;;  %s1959_s23 = sshll.u32 (!%p390_p9), %s2274_s29, 3 }
  0x13   : > { %s1656_s17 = sshll.u32 (!%p390_p9), %s429_s27, 3 }
  0x16   : > { %s433_s20 = scalar_select %p432_p10, %s2274_s29, 1  ;;  %v2180_v1 = vmov 128.0   ;;  %v1969_v2 = vld [vmem:[%s2730_s3 + $0x38] sm:$0xff]  ;;  %v1968_v16 = vld [vmem:[%s2730_s3 + $0x30] sm:$0xff]  ;;  %v1967_v20 = vld [vmem:[%s2730_s3 + $0x28] sm:$0xff]  ;;  %vm809_vm4 = vcmask 261120  }
  0x17   : > { %2086 = vrcp.f32 %v2180_v1  ;;  %v1977_v3 = vld [vmem:[%s2730_s3 + $0x78] sm:$0xff]  ;;  %604 = vmatpush.bf16.msra.mxu0 %v1969_v2  ;;  %v1976_v17 = vld [vmem:[%s2730_s3 + $0x70] sm:$0xff]  ;;  %v1975_v21 = vld [vmem:[%s2730_s3 + $0x68] sm:$0xff]  ;;  %vm901_vm5 = vcmask 64512   ;;  %vm955_vm6 = vcmask 1043456   ;;  %s1578_s29 = scalar_lea.sflag [#allocation3], %s429_s27 }
  0x18   : > { %s1657_s21 = sshll.u32 %s433_s20, 3  ;;  %v1985_v4 = vld [vmem:[%s2730_s3 + $0xb8] sm:$0xff]  ;;  %665 = vmatpush.bf16.msra.mxu1 %v1977_v3  ;;  %v1984_v18 = vld [vmem:[%s2730_s3 + $0xb0] sm:$0xff]  ;;  %v1983_v22 = vld [vmem:[%s2730_s3 + $0xa8] sm:$0xff]  ;;  %s1588_s20 = scalar_lea.hbm %s2740_s13, %s1959_s23 }
  0x19   : > { %s435_s24 = scalar_lea.vmem %s2747_s0, %s1657_s21  ;;  %v1993_v5 = vld [vmem:[%s2730_s3 + $0xf8] sm:$0xff]  ;;  %726 = vmatpush.bf16.msra.mxu2 %v1985_v4  ;;  %v1992_v19 = vld [vmem:[%s2730_s3 + $0xf0] sm:$0xff]  ;;  %v1991_v23 = vld [vmem:[%s2730_s3 + $0xe8] sm:$0xff]  ;;  %s2182_s21 = smov 64  }
  0x1a   : > { %v2306_v0 = vld [vmem:[%s435_s24] sm:$0xff]  ;;  %787 = vmatpush.bf16.msra.mxu3 %v1993_v5  ;;  %v1965_v28 = vld [vmem:[%s2730_s3 + $0x18] sm:$0xff]  ;;  %v1964_v32 = vld [vmem:[%s2730_s3 + $0x10] sm:$0xff]  ;;  %s1592_s0 = sshll.u32 %s1588_s20, 4  ;;  %s1593_s0 = int_to_ptr.hbm [resolvable:$true] %s1592_s0 }
  0x1b   : > { %438 = vadd.xlane.f32.xlu0 %v2306_v0  ;;  %605 = vmatpush.bf16.msra.mxu0 %v1968_v16  ;;  %v1966_v24 = vld [vmem:[%s2730_s3 + $0x20] sm:$0xff]  ;;  %v1973_v29 = vld [vmem:[%s2730_s3 + $0x58] sm:$0xff]  ;;  %v1972_v33 = vld [vmem:[%s2730_s3 + $0x50] sm:$0xff]  ;;  %s2130_s24 = sshra.s32 %s1593_s0, 4  ;;  %s2131_s24 = int_to_ptr.hbm [resolvable:$true] %s2130_s24 }
  0x1c   : > { %666 = vmatpush.bf16.msra.mxu1 %v1976_v17  ;;  %v1974_v25 = vld [vmem:[%s2730_s3 + $0x60] sm:$0xff]  ;;  %v1981_v30 = vld [vmem:[%s2730_s3 + $0x98] sm:$0xff]  ;;  %v1980_v34 = vld [vmem:[%s2730_s3 + $0x90] sm:$0xff]  ;;  %s2132_s30 = scalar_lea.hbm %s2131_s24, 8  ;;  %p2137_p0 = scmp.lt.s32.totalorder %s2131_s24, %s2740_s13 }
  0x1d   : > { %v2087_v6 = vpop.eup %2086  ;;  %727 = vmatpush.bf16.msra.mxu2 %v1984_v18  ;;  %v1982_v26 = vld [vmem:[%s2730_s3 + $0xa0] sm:$0xff]  ;;  %v1989_v31 = vld [vmem:[%s2730_s3 + $0xd8] sm:$0xff]  ;;  %v1988_v35 = vld [vmem:[%s2730_s3 + $0xd0] sm:$0xff]  ;;  %p2133_p11 = scmp.ne.s32.totalorder %s2131_s24, %s2132_s30 }
  0x1e   : > { %v441_v7 = vmul.f32 128.0, %v2087_v6  ;;  %vm445_vm0 = vweird.f32 %v2087_v6  ;;  %788 = vmatpush.bf16.msra.mxu3 %v1992_v19  ;;  %v1990_v27 = vld [vmem:[%s2730_s3 + $0xe0] sm:$0xff]  ;;  %v1963_v36 = vld [vmem:[%s2730_s3 + $0x8] sm:$0xff] }
  0x1f   : > { %606 = vmatpush.bf16.msra.mxu0 %v1967_v20  ;;  %v1971_v37 = vld [vmem:[%s2730_s3 + $0x48] sm:$0xff]  ;;  %v1962_v40 = vld [vmem:[%s2730_s3] sm:$0xff]  ;;  %p2134_p12 = pnand %p2133_p11, %p2291_p5 }
  0x20   : > { %v442_v8 = vsub.f32 1.0, %v441_v7  ;;  %667 = vmatpush.bf16.msra.mxu1 %v1975_v21  ;;  %v1979_v38 = vld [vmem:[%s2730_s3 + $0x88] sm:$0xff]  ;;  %v1970_v41 = vld [vmem:[%s2730_s3 + $0x40] sm:$0xff] }
  0x21   : > { %728 = vmatpush.bf16.msra.mxu2 %v1983_v22  ;;  %v1987_v39 = vld [vmem:[%s2730_s3 + $0xc8] sm:$0xff]  ;;  %v1978_v42 = vld [vmem:[%s2730_s3 + $0x80] sm:$0xff]  ;;  %p2135_p13 = pneg %p2134_p12 }
  0x22   : > { %v443_v9 = vmul.f32 %v2087_v6, %v442_v8  ;;  %789 = vmatpush.bf16.msra.mxu3 %v1991_v23  ;;  %v1986_v43 = vld [vmem:[%s2730_s3 + $0xc0] sm:$0xff] }
  0x23   : > { %607 = vmatpush.bf16.msra.mxu0 %v1966_v24  ;;  %v2076_v53 = vld [vmem:[%s2728_s1] ss:$0 sm:$0xff]  ;;  %v2079_v61 = vld [vmem:[%s2731_s4 + $0x1] ss:$0 sm:$0xff]  ;;  %v2080_v4 = vld [vmem:[%s2731_s4 + $0x2] ss:$0 sm:$0xff] }
  0x24   : > { %v444_v10 = vadd.f32 %v2087_v6, %v443_v9  ;;  %668 = vmatpush.bf16.msra.mxu1 %v1974_v25  ;;  %v2077_v56 = vld [vmem:[%s2729_s2] ss:$0 sm:$0xff] }
  0x25   : > { %729 = vmatpush.bf16.msra.mxu2 %v1982_v26  ;;  %v2078_v60 = vld [vmem:[%s2731_s4] ss:$0 sm:$0xff] }
  0x26   : > { %v2321_v11 = vsel %vm445_vm0, %v2087_v6, %v444_v10  ;;  %790 = vmatpush.bf16.msra.mxu3 %v1990_v27  ;;  %v2081_v6 = vld [vmem:[%s2731_s4 + $0x3] ss:$0 sm:$0xff] }
  0x27   : > { %608 = vmatpush.bf16.msra.mxu0 %v1965_v28 }
  0x28   : > { %669 = vmatpush.bf16.msra.mxu1 %v1973_v29 }
  0x29   : > { %730 = vmatpush.bf16.msra.mxu2 %v1981_v30 }
  0x2a   : > { %791 = vmatpush.bf16.msra.mxu3 %v1989_v31 }
  0x2b   : > { %609 = vmatpush.bf16.msra.mxu0 %v1964_v32 }
  0x2c   : > { %670 = vmatpush.bf16.msra.mxu1 %v1972_v33 }
  0x2d   : > { %731 = vmatpush.bf16.msra.mxu2 %v1980_v34 }
  0x2e   : > { %792 = vmatpush.bf16.msra.mxu3 %v1988_v35 }
  0x2f   : > { %610 = vmatpush.bf16.msra.mxu0 %v1963_v36 }
  0x30   : > { %671 = vmatpush.bf16.msra.mxu1 %v1971_v37 }
  0x31   : > { %732 = vmatpush.bf16.msra.mxu2 %v1979_v38 }
  0x32   : > { %793 = vmatpush.bf16.msra.mxu3 %v1987_v39 }
  0x33   : > { %611 = vmatpush.bf16.msra.mxu0 %v1962_v40 }
  0x34   : > { %672 = vmatpush.bf16.msra.mxu1 %v1970_v41 }
  0x35   : > { %733 = vmatpush.bf16.msra.mxu2 %v1978_v42 }
  0x36   : > { %794 = vmatpush.bf16.msra.mxu3 %v1986_v43 }
  0x8e   : > { %v439_v12 = vpop.xlane.xlu0 %438 }
  0x8f   : > { %v447_v13 = vmul.f32 %v2321_v11, %v439_v12 }
  0x91   : > { %v2325_v14 = vsub.f32 %v2306_v0, %v447_v13 }
  0x93   : > { %v449_v15 = vmul.f32 %v2325_v14, %v2325_v14 }
  0x95   : > { %450 = vadd.xlane.f32.xlu0 %v449_v15 }
 0x108   : > { %v451_v44 = vpop.xlane.xlu0 %450 }
 0x109   : > { %v452_v45 = vmul.f32 %v451_v44, %v2321_v11 }
 0x10b   : > { %v453_v46 = vadd.f32 1e-05, %v452_v45 }
 0x10d   : > { %2088 = vrsqrt.f32 %v453_v46  ;;  %vm460_vm2 = vweird.f32 %v453_v46 }
 0x113   : > { %v2089_v47 = vpop.eup %2088 }
 0x114   : > { %v455_v48 = vmul.f32 %v2089_v47, %v453_v46  ;;  %vm461_vm1 = vweird.f32 %v2089_v47 }
 0x115   : > { %vm462_vm3 = vmor %vm460_vm2, %vm461_vm1 }
 0x116   : > { %v456_v49 = vmul.f32 %v2089_v47, %v455_v48 }
 0x118   : > { %v457_v50 = vmul.f32 0.5, %v456_v49 }
 0x11a   : > { %v458_v51 = vsub.f32 1.5, %v457_v50 }
 0x11c   : > { %v459_v52 = vmul.f32 %v2089_v47, %v458_v51 }
 0x11e   : > { %v463_v54 = vsel %vm462_vm3, %v2089_v47, %v459_v52 }
 0x11f   : > { %v464_v55 = vmul.f32 %v463_v54, %v2325_v14 }
 0x121   : > { %v469_v57 = vmul.f32 %v2076_v53, %v464_v55 }
 0x123   : > { %v474_v58 = vadd.f32 %v2077_v56, %v469_v57 }
 0x125   : > { %v475_v59 = vpack.c.bf16 %v474_v58, %v474_v58 }
 0x127   : > { %612 = vmatmul.bf16.vlgmr.msra.gmra.mxu0 %v475_v59  ;;  %673 = vmatmul.bf16.vlgmr.msra.gmra.mxu1 %v475_v59 }
 0x128   : > { %734 = vmatmul.bf16.vlgmr.msra.gmra.mxu2 %v475_v59  ;;  %795 = vmatmul.bf16.vlgmr.msra.gmra.mxu3 %v475_v59 }
 0x1a4   : > { %v613_v62 = vpop.f32.mrf.mxu0  ;;  %v674_v63 = vpop.f32.mrf.mxu1 }
 0x1a5   : > { %v614_v1 = vadd.f32 %v2078_v60, %v613_v62  ;;  %v675_v3 = vadd.f32 %v2079_v61, %v674_v63 }
 0x1a7   : > { %v800_v2 = vpack.c.bf16 %v614_v1, %v614_v1  ;;  %v801_v7 = vpack.c.bf16 %v675_v3, %v675_v3 }
 0x1a9   : > { %v805_v5 = vunpack.c.l.b16 %v800_v2  ;;  %v830_v17 = vunpack.c.l.b16 %v801_v7 }
 0x1ab   : > { %v735_v8 = vpop.f32.mrf.mxu2  ;;  %v796_v9 = vpop.f32.mrf.mxu3  ;;  %v2433_v10 = vpack.c.b16 %v805_v5, %v805_v5  ;;  %v2436_v21 = vpack.c.b16 %v830_v17, %v830_v17 }
 0x1ac   : > { %v736_v12 = vadd.f32 %v2080_v4, %v735_v8  ;;  %v615_v13 = vpop.f32.mrf.mxu0  ;;  %v676_v14 = vpop.f32.mrf.mxu1  ;;  %v797_v16 = vadd.f32 %v2081_v6, %v796_v9  ;;  %v1999_v9 = vld [vmem:[%s2732_s5 + $0x28] sm:$0xff] }
 0x1ad   : > { %807 = vrot.lane.b32.xlu2 %v2433_v10, %s2181_s22 }
 0x1ae   : > { %v802_v15 = vpack.c.bf16 %v736_v12, %v736_v12  ;;  %v803_v19 = vpack.c.bf16 %v797_v16, %v797_v16 }
 0x1b0   : > { %v854_v18 = vunpack.c.l.b16 %v802_v15  ;;  %v878_v24 = vunpack.c.l.b16 %v803_v19 }
 0x1b2   : > { %v855_v20 = vpack.c.b16 %v854_v18, %v854_v18  ;;  %v879_v25 = vpack.c.b16 %v878_v24, %v878_v24 }
 0x1b3   : > { %v737_v22 = vpop.f32.mrf.mxu2  ;;  %v798_v23 = vpop.f32.mrf.mxu3 }
 0x1b4   : > { %856 = vrot.lane.b32.xlu1 %v855_v20, %s2181_s22 }
 0x1b5   : > { %832 = vrot.lane.b32.xlu2 %v2436_v21, %s2181_s22 }
 0x1bc   : > { %880 = vrot.lane.b32.xlu1 %v879_v25, %s2181_s22  ;;  %s431_s22 = scalar_lea.vmem [#allocation2], %s1656_s17  ;;  %s2136_s17 = scalar_lea.hbm %s2740_s13, 16 }
 0x1bd   : > { %p2138_p1 = scmp.lt.s32.totalorder %s2136_s17, %s2132_s30 }
 0x1bf   : > { %p2139_p2 = por %p2138_p1, %p2137_p0 }
 0x1c1   : > { %p2140_p3 = pnand %p2139_p2, %p2135_p13 }
 0x207   : > { %v808_v26 = vpop.permute.xlu2 %807 }
 0x208   : > { %v814_v27 = vsel %vm809_vm4, %v808_v26, 0 }
 0x209   : > { %823 = vmatpush.bf16.xpose.msrb.mxu0 %v814_v27 }
 0x20f   : > { %v833_v28 = vpop.permute.xlu2 %832 }
 0x210   : > { %1786 = vmatmul.msk.bf16.vlgmr.msrb.gmra.mxu0 %vm809_vm4, %v800_v2  ;;  %v838_v29 = vsel %vm809_vm4, %v833_v28, 0 }
 0x211   : > { %847 = vmatpush.bf16.xpose.msrb.mxu1 %v838_v29  ;;  %v1998_v29 = vld [vmem:[%s2732_s5 + $0x20] sm:$0xff] }
 0x218   : > { %1787 = vmatmul.msk.bf16.vlgmr.msrb.gmra.mxu1 %vm809_vm4, %v801_v7 }
 0x226   : > { %v857_v30 = vpop.permute.xlu1 %856 }
 0x227   : > { %v862_v31 = vsel %vm809_vm4, %v857_v30, 0  ;;  %v2001_v30 = vld [vmem:[%s2732_s5 + $0x38] sm:$0xff] }
 0x228   : > { %871 = vmatpush.bf16.xpose.msrb.mxu2 %v862_v31  ;;  %v2000_v31 = vld [vmem:[%s2732_s5 + $0x30] sm:$0xff] }
 0x22e   : > { %v881_v32 = vpop.permute.xlu1 %880 }
 0x22f   : > { %1788 = vmatmul.msk.bf16.vlgmr.msrb.gmra.mxu2 %vm809_vm4, %v802_v15  ;;  %v886_v33 = vsel %vm809_vm4, %v881_v32, 0  ;;  %v1997_v32 = vld [vmem:[%s2732_s5 + $0x18] sm:$0xff] }
 0x230   : > { %895 = vmatpush.bf16.xpose.msrb.mxu3 %v886_v33  ;;  %v1996_v33 = vld [vmem:[%s2732_s5 + $0x10] sm:$0xff] }
 0x237   : > { %1789 = vmatmul.msk.bf16.vlgmr.msrb.gmra.mxu3 %vm809_vm4, %v803_v19 }
 0x28d   : > { %v825_v34 = vpop.f32.mrf.mxu0 }
 0x28e   : > { %v902_v35 = vsel %vm901_vm5, %v825_v34, -inf }
 0x28f   : > { %903 = vmax.xlane.f32.xlu2 %v902_v35  ;;  %v1994_v35 = vld [vmem:[%s2732_s5] sm:$0xff] }
 0x295   : > { %v827_v36 = vpop.f32.mrf.mxu0  ;;  %v849_v37 = vpop.f32.mrf.mxu1 }
 0x296   : > { %v905_v44 = vsel %vm901_vm5, %v849_v37, -inf }
 0x29d   : > { %v851_v38 = vpop.f32.mrf.mxu1 }
 0x2b2   : > { %v873_v39 = vpop.f32.mrf.mxu2 }
 0x2b3   : > { %v908_v40 = vsel %vm901_vm5, %v873_v39, -inf }
 0x2b4   : > { %909 = vmax.xlane.f32.xlu0 %v908_v40 }
 0x2ba   : > { %v875_v41 = vpop.f32.mrf.mxu2  ;;  %v897_v42 = vpop.f32.mrf.mxu3 }
 0x2bb   : > { %v911_v43 = vsel %vm901_vm5, %v897_v42, -inf }
 0x2bc   : > { %912 = vmax.xlane.f32.xlu1 %v911_v43  ;;  %906 = vmax.xlane.f32.xlu0 %v905_v44 }
 0x2c2   : > { %v899_v45 = vpop.f32.mrf.mxu3 }
 0x2d0   : > { %993 = vrot.lane.b32.xlu0 %v855_v20, %s2182_s21 }
 0x302   : > { %v904_v46 = vpop.xlane.xlu2 %903 }
 0x303   : > { %v914_v47 = vsub.f32 %v825_v34, %v904_v46  ;;  %v1995_v34 = vld [vmem:[%s2732_s5 + $0x8] sm:$0xff] }
 0x305   : > { %v918_v48 = vmul.f32 1.442695, %v914_v47 }
 0x307   : > { %2090 = vpow2.f32 %v918_v48 }
 0x30d   : > { %v2091_v49 = vpop.eup %2090 }
 0x30e   : > { %v926_v50 = vsel %vm901_vm5, %v2091_v49, 0.0 }
 0x30f   : > { %927 = vadd.xlane.f32.xlu2 %v926_v50 }
 0x327   : > { %v910_v51 = vpop.xlane.xlu0 %909  ;;  %1014 = vrot.lane.b32.xlu2 %v879_v25, %s2182_s21 }
 0x328   : > { %v916_v52 = vsub.f32 %v873_v39, %v910_v51 }
 0x32a   : > { %v922_v53 = vmul.f32 1.442695, %v916_v52 }
 0x32c   : > { %2092 = vpow2.f32 %v922_v53 }
 0x32f   : > { %v913_v54 = vpop.xlane.xlu1 %912  ;;  %v907_v55 = vpop.xlane.xlu0 %906 }
 0x330   : > { %v917_v56 = vsub.f32 %v897_v42, %v913_v54  ;;  %v915_v57 = vsub.f32 %v849_v37, %v907_v55 }
 0x332   : > { %v2093_v58 = vpop.eup %2092  ;;  %v924_v59 = vmul.f32 1.442695, %v917_v56  ;;  %v920_v60 = vmul.f32 1.442695, %v915_v57  ;;  %v2082_v57 = vld [vmem:[%s2733_s6] ss:$0 sm:$0xff] }
 0x333   : > { %v932_v61 = vsel %vm901_vm5, %v2093_v58, 0.0 }
 0x334   : > { %2094 = vpow2.f32 %v924_v59  ;;  %933 = vadd.xlane.f32.xlu0 %v932_v61 }
 0x335   : > { %2096 = vpow2.f32 %v920_v60 }
 0x33a   : > { %v2095_v62 = vpop.eup %2094 }
 0x33b   : > { %v2097_v63 = vpop.eup %2096  ;;  %v935_v1 = vsel %vm901_vm5, %v2095_v62, 0.0 }
 0x33c   : > { %936 = vadd.xlane.f32.xlu0 %v935_v1  ;;  %v929_v2 = vsel %vm901_vm5, %v2097_v63, 0.0  ;;  %v2016_v1 = vld [vmem:[%s2736_s9 + $0x74] sm:$0xf] }
 0x33d   : > { %930 = vadd.xlane.f32.xlu1 %v929_v2 }
 0x342   : > { %v994_v3 = vpop.permute.xlu0 %993 }
 0x343   : > { %v999_v4 = vsel %vm955_vm6, %v994_v3, 0 }
 0x344   : > { %1008 = vmatpush.bf16.msra.mxu2 %v999_v4 }
 0x348   : > { %1132 = vmatpush.bf16.msrb.mxu2 %v1999_v9  ;;  %v2015_v9 = vld [vmem:[%s2736_s9 + $0x64] sm:$0xf0] }
 0x34c   : > { %1133 = vmatpush.bf16.msrb.mxu2 %v1998_v29  ;;  %v2008_v29 = vld [vmem:[%s2736_s9 + $0x34] sm:$0xf] }
 0x350   : > { %972 = vrot.lane.b32.xlu0 %v2436_v21, %s2182_s21 }
 0x356   : > { %950 = vrot.lane.b32.xlu1 %v2433_v10, %s2182_s21  ;;  %s1590_s21 = sshll.u32 %s431_s22, 4  ;;  %s1591_s21 = int_to_ptr.vmem [resolvable:$true] %s1590_s21 }
 0x382   : > { %v928_v5 = vpop.xlane.xlu2 %927 }
 0x38a   : > { %v1015_v6 = vpop.permute.xlu2 %1014 }
 0x38b   : > { %v1020_v7 = vsel %vm955_vm6, %v1015_v6, 0 }
 0x38c   : > { %1029 = vmatpush.bf16.msra.mxu3 %v1020_v7 }
 0x390   : > { %1160 = vmatpush.bf16.msrb.mxu3 %v2001_v30 }
 0x394   : > { %1161 = vmatpush.bf16.msrb.mxu3 %v2000_v31  ;;  %v1858_v31 = vld [vmem:[%s2736_s9 + $0x38] sm:$0xf0] }
 0x3a7   : > { %v934_v8 = vpop.xlane.xlu0 %933 }
 0x3a8   : > { %2098 = vrcp.f32 %v934_v8  ;;  %v1880_v8 = vld [vmem:[%s2736_s9 + $0x60] sm:$0xf] }
 0x3ae   : > { %v2099_v12 = vpop.eup %2098 }
 0x3af   : > { %v944_v13 = vmul.f32 %v2099_v12, %v2093_v58  ;;  %v937_v14 = vpop.xlane.xlu0 %936  ;;  %v2014_v12 = vld [vmem:[%s2736_s9 + $0x64] sm:$0xf] }
 0x3b0   : > { %2100 = vrcp.f32 %v937_v14  ;;  %v931_v10 = vpop.xlane.xlu1 %930  ;;  %v1882_v14 = vld [vmem:[%s2736_s9 + $0x68] sm:$0xf0] }
 0x3b1   : > { %v948_v15 = vpack.c.bf16 %v944_v13, %v944_v13  ;;  %2102 = vrcp.f32 %v931_v10  ;;  %v1881_v13 = vor.u32 %v2015_v9, %v1880_v8  ;;  %v1872_v10 = vld [vmem:[%s2736_s9 + $0x50] sm:$0xf] }
 0x3b2   : > { %2104 = vrcp.f32 %v928_v5 }
 0x3b3   : > { %1792 = vmatmul.msk.bf16.vlgmr.msra.gmra.mxu2 %vm901_vm5, %v948_v15  ;;  %v1885_v15 = vor.u32 %v2014_v12, %v1882_v14  ;;  %v2024_v12 = vld [vmem:[%s2738_s11 + $0x30] sm:$0xff] }
 0x3b6   : > { %v2101_v16 = vpop.eup %2100 }
 0x3b7   : > { %v945_v17 = vmul.f32 %v2101_v16, %v2095_v62  ;;  %v2103_v19 = vpop.eup %2102  ;;  %v1888_v62 = vld [vmem:[%s2736_s9 + $0x70] sm:$0xf]  ;;  %v2013_v16 = vld [vmem:[%s2736_s9 + $0x54] sm:$0xf0] }
 0x3b8   : > { %v943_v20 = vmul.f32 %v2103_v19, %v2097_v63  ;;  %v2105_v23 = vpop.eup %2104  ;;  %v2017_v63 = vld [vmem:[%s2736_s9 + $0x74] sm:$0xf0]  ;;  %v1874_v19 = vld [vmem:[%s2736_s9 + $0x58] sm:$0xf0] }
 0x3b9   : > { %v949_v18 = vpack.c.bf16 %v945_v17, %v945_v17  ;;  %v942_v25 = vmul.f32 %v2105_v23, %v2091_v49  ;;  %v1889_v2 = vor.u32 %v2017_v63, %v1888_v62  ;;  %v2012_v17 = vld [vmem:[%s2736_s9 + $0x54] sm:$0xf]  ;;  %v2010_v23 = vld [vmem:[%s2736_s9 + $0x44] sm:$0xf] }
 0x3ba   : > { %v947_v24 = vpack.c.bf16 %v943_v20, %v943_v20  ;;  %v1877_v20 = vor.u32 %v2012_v17, %v1874_v19  ;;  %v2023_v17 = vld [vmem:[%s2738_s11 + $0x28] sm:$0xff] }
 0x3bb   : > { %1793 = vmatmul.msk.bf16.vlgmr.msra.gmra.mxu3 %vm901_vm5, %v949_v18  ;;  %v946_v28 = vpack.c.bf16 %v942_v25, %v942_v25  ;;  %v1873_v18 = vor.u32 %v2013_v16, %v1872_v10  ;;  %v1866_v25 = vld [vmem:[%s2736_s9 + $0x48] sm:$0xf0] }
 0x3c2   : > { %v973_v21 = vpop.permute.xlu0 %972 }
 0x3c3   : > { %v978_v22 = vsel %vm955_vm6, %v973_v21, 0  ;;  %v1864_v21 = vld [vmem:[%s2736_s9 + $0x40] sm:$0xf] }
 0x3c4   : > { %987 = vmatpush.bf16.msra.mxu1 %v978_v22  ;;  %v2011_v22 = vld [vmem:[%s2736_s9 + $0x44] sm:$0xf0] }
 0x3c7   : > { %1791 = vmatmul.msk.bf16.vlgmr.msra.gmra.mxu1 %vm901_vm5, %v947_v24  ;;  %v1865_v24 = vor.u32 %v2011_v22, %v1864_v21 }
 0x3c8   : > { %v951_v26 = vpop.permute.xlu1 %950  ;;  %1104 = vmatpush.bf16.msrb.mxu1 %v1997_v32  ;;  %v1861_v32 = vor.u32 %v2008_v29, %v1858_v31  ;;  %v2021_v29 = vld [vmem:[%s2738_s11 + $0x18] sm:$0xff]  ;;  %v2020_v31 = vld [vmem:[%s2738_s11 + $0x10] sm:$0xff] }
 0x3c9   : > { %v957_v27 = vsel %vm955_vm6, %v951_v26, 0  ;;  %v1869_v26 = vor.u32 %v2010_v23, %v1866_v25  ;;  %v2022_v25 = vld [vmem:[%s2738_s11 + $0x20] sm:$0xff] }
 0x3ca   : > { %966 = vmatpush.bf16.msra.mxu0 %v957_v27  ;;  %v1856_v27 = vld [vmem:[%s2736_s9 + $0x30] sm:$0xf] }
 0x3cc   : > { %1105 = vmatpush.bf16.msrb.mxu1 %v1996_v33  ;;  %v1848_v33 = vld [vmem:[%s2736_s9 + $0x20] sm:$0xf] }
 0x3cd   : > { %1790 = vmatmul.msk.bf16.vlgmr.msra.gmra.mxu0 %vm901_vm5, %v946_v28  ;;  %v2009_v28 = vld [vmem:[%s2736_s9 + $0x34] sm:$0xf0] }
 0x3ce   : > { %1076 = vmatpush.bf16.msrb.mxu0 %v1995_v34  ;;  %v1857_v30 = vor.u32 %v2009_v28, %v1856_v27  ;;  %v2007_v34 = vld [vmem:[%s2736_s9 + $0x24] sm:$0xf0] }
 0x3d2   : > { %1077 = vmatpush.bf16.msrb.mxu0 %v1994_v35  ;;  %v2006_v35 = vld [vmem:[%s2736_s9 + $0x24] sm:$0xf] }
 0x3d6   : > { %1309 = vmatpush.bf16.msra.mxu0 %v1889_v2 }
 0x3da   : > { %1310 = vmatpush.bf16.msra.mxu0 %v1881_v13  ;;  %v2032_v13 = vld [vmem:[%s2738_s11 + $0x70] sm:$0xff] }
 0x3de   : > { %1311 = vmatpush.bf16.msra.mxu0 %v1873_v18  ;;  %v2031_v18 = vld [vmem:[%s2738_s11 + $0x68] sm:$0xff] }
 0x3e2   : > { %1312 = vmatpush.bf16.msra.mxu0 %v1865_v24 }
 0x3e6   : > { %1313 = vmatpush.bf16.msra.mxu0 %v1857_v30  ;;  %v2029_v30 = vld [vmem:[%s2738_s11 + $0x58] sm:$0xff] }
 0x436   : > { %v1010_v36 = vpop.f32.mrf.mxu2 }
 0x437   : > { %v1037_v37 = vpack.c.bf16 %v1010_v36, %v1010_v36  ;;  %v1849_v36 = vor.u32 %v2007_v34, %v1848_v33 }
 0x439   : > { %1820 = vmatmul.msk.bf16.vlgmr.msrb.gmra.mxu2 %vm809_vm4, %v1037_v37  ;;  %v1850_v37 = vld [vmem:[%s2736_s9 + $0x28] sm:$0xf0]  ;;  %1314 = vmatpush.bf16.msra.mxu0 %v1849_v36 }
 0x43e   : > { %v1012_v38 = vpop.f32.mrf.mxu2  ;;  %v1031_v39 = vpop.f32.mrf.mxu3 }
 0x43f   : > { %v1038_v40 = vpack.c.bf16 %v1031_v39, %v1031_v39  ;;  %v1853_v38 = vor.u32 %v2006_v35, %v1850_v37  ;;  %v1840_v39 = vld [vmem:[%s2736_s9 + $0x10] sm:$0xf] }
 0x441   : > { %1829 = vmatmul.msk.bf16.vlgmr.msrb.gmra.mxu3 %vm809_vm4, %v1038_v40  ;;  %v2005_v40 = vld [vmem:[%s2736_s9 + $0x14] sm:$0xf0] }
 0x444   : > { %v989_v41 = vpop.f32.mrf.mxu1 }
 0x445   : > { %v1036_v42 = vpack.c.bf16 %v989_v41, %v989_v41  ;;  %v2004_v41 = vld [vmem:[%s2736_s9 + $0x14] sm:$0xf] }
 0x446   : > { %v1033_v43 = vpop.f32.mrf.mxu3 }
 0x447   : > { %1811 = vmatmul.msk.bf16.vlgmr.msrb.gmra.mxu1 %vm809_vm4, %v1036_v42  ;;  %v1841_v42 = vor.u32 %v2005_v40, %v1840_v39  ;;  %v1842_v43 = vld [vmem:[%s2736_s9 + $0x18] sm:$0xf0]  ;;  %v2027_v39 = vld [vmem:[%s2738_s11 + $0x48] sm:$0xff] }
 0x449   : > { %1315 = vmatpush.bf16.msra.mxu0 %v1841_v42 }
 0x44a   : > { %v968_v44 = vpop.f32.mrf.mxu0 }
 0x44b   : > { %v1035_v45 = vpack.c.bf16 %v968_v44, %v968_v44  ;;  %v1845_v44 = vor.u32 %v2004_v41, %v1842_v43 }
 0x44c   : > { %v991_v46 = vpop.f32.mrf.mxu1 }
 0x44d   : > { %1802 = vmatmul.msk.bf16.vlgmr.msrb.gmra.mxu0 %vm809_vm4, %v1035_v45  ;;  %v1832_v45 = vld [vmem:[%s2736_s9] sm:$0xf]  ;;  %v2003_v46 = vld [vmem:[%s2736_s9 + $0x4] sm:$0xf0] }
 0x452   : > { %v970_v47 = vpop.f32.mrf.mxu0 }
 0x453   : > { %v2002_v47 = vld [vmem:[%s2736_s9 + $0x4] sm:$0xf] }
 0x4bc   : > { %v1135_v48 = vpop.f32.mrf.mxu2 }
 0x4c4   : > { %v1107_v49 = vpop.f32.mrf.mxu1  ;;  %v1137_v50 = vpop.f32.mrf.mxu2 }
 0x4c5   : > { %v1163_v51 = vpop.f32.mrf.mxu3 }
 0x4ca   : > { %v1079_v52 = vpop.f32.mrf.mxu0 }
 0x4cb   : > { %v1167_v53 = vadd.f32 %v1107_v49, %v1079_v52  ;;  %v1834_v49 = vld [vmem:[%s2736_s9 + $0x8] sm:$0xf0] }
 0x4cc   : > { %v1109_v54 = vpop.f32.mrf.mxu1  ;;  %v1837_v50 = vor.u32 %v2002_v47, %v1834_v49  ;;  %v2026_v49 = vld [vmem:[%s2738_s11 + $0x40] sm:$0xff] }
 0x4cd   : > { %v1168_v55 = vadd.f32 %v1167_v53, %v1135_v48  ;;  %v1165_v56 = vpop.f32.mrf.mxu3  ;;  %v1833_v48 = vor.u32 %v2003_v46, %v1832_v45 }
 0x4cf   : > { %v1169_v58 = vadd.f32 %v1168_v55, %v1163_v51  ;;  %1316 = vmatpush.bf16.msra.mxu0 %v1833_v48  ;;  %v2018_v48 = vld [vmem:[%s2738_s11] sm:$0xff] }
 0x4d1   : > { %v1174_v59 = vadd.f32 %v2082_v57, %v1169_v58 }
 0x4d2   : > { %v1081_v60 = vpop.f32.mrf.mxu0 }
 0x4d3   : > { %v2501_v61 = vadd.f32 %v1174_v59, %v2306_v0  ;;  %v1890_v0 = vld [vmem:[%s2736_s9 + $0x78] sm:$0xf0]  ;;  %v2083_v60 = vld [vmem:[%s2734_s7] ss:$0 sm:$0xff] }
 0x4d4   : > { %v1893_v3 = vor.u32 %v2016_v1, %v1890_v0 }
 0x4d5   : > { %1176 = vadd.xlane.f32.xlu0 %v2501_v61 }
 0x4d6   : > { %1322 = vmatpush.bf16.msra.mxu1 %v1893_v3  ;;  %v1223_v3 = vld [vmem:[%s2737_s10] sm:$0x3] }
 0x4da   : > { %1323 = vmatpush.bf16.msra.mxu1 %v1885_v15 }
 0x4de   : > { %1324 = vmatpush.bf16.msra.mxu1 %v1877_v20 }
 0x4e2   : > { %1325 = vmatpush.bf16.msra.mxu1 %v1869_v26  ;;  %v2030_v26 = vld [vmem:[%s2738_s11 + $0x60] sm:$0xff] }
 0x4e6   : > { %1326 = vmatpush.bf16.msra.mxu1 %v1861_v32  ;;  %v2028_v32 = vld [vmem:[%s2738_s11 + $0x50] sm:$0xff] }
 0x4ea   : > { %1327 = vmatpush.bf16.msra.mxu1 %v1853_v38  ;;  %v2019_v38 = vld [vmem:[%s2738_s11 + $0x8] sm:$0xff] }
 0x4ee   : > { %1328 = vmatpush.bf16.msra.mxu1 %v1845_v44 }
 0x4f2   : > { %1329 = vmatpush.bf16.msra.mxu1 %v1837_v50 }
 0x548   : > { %v1177_v4 = vpop.xlane.xlu0 %1176 }
 0x549   : > { %v1178_v5 = vmul.f32 %v1177_v4, %v2321_v11  ;;  %v2025_v4 = vld [vmem:[%s2738_s11 + $0x38] sm:$0xff] }
 0x54a   : > { %1549 = vmatpush.bf16.msra.mxu2 %v2025_v4 }
 0x54b   : > { %v2518_v6 = vsub.f32 %v2501_v61, %v1178_v5  ;;  %v2033_v5 = vld [vmem:[%s2738_s11 + $0x78] sm:$0xff] }
 0x54c   : > { %1562 = vmatpush.bf16.msra.mxu3 %v2033_v5 }
 0x54d   : > { %v1180_v7 = vmul.f32 %v2518_v6, %v2518_v6 }
 0x54e   : > { %1550 = vmatpush.bf16.msra.mxu2 %v2024_v12 }
 0x54f   : > { %1181 = vadd.xlane.f32.xlu2 %v1180_v7  ;;  %v1226_v7 = vperm.slane %v1223_v3, 1 }
 0x550   : > { %1563 = vmatpush.bf16.msra.mxu3 %v2032_v13 }
 0x552   : > { %1551 = vmatpush.bf16.msra.mxu2 %v2023_v17 }
 0x554   : > { %1564 = vmatpush.bf16.msra.mxu3 %v2031_v18 }
 0x556   : > { %1552 = vmatpush.bf16.msra.mxu2 %v2022_v25 }
 0x558   : > { %1565 = vmatpush.bf16.msra.mxu3 %v2030_v26 }
 0x55a   : > { %1553 = vmatpush.bf16.msra.mxu2 %v2021_v29 }
 0x55c   : > { %1566 = vmatpush.bf16.msra.mxu3 %v2029_v30 }
 0x55e   : > { %1554 = vmatpush.bf16.msra.mxu2 %v2020_v31 }
 0x560   : > { %1567 = vmatpush.bf16.msra.mxu3 %v2028_v32 }
 0x562   : > { %1555 = vmatpush.bf16.msra.mxu2 %v2019_v38 }
 0x564   : > { %1568 = vmatpush.bf16.msra.mxu3 %v2027_v39 }
 0x566   : > { %1556 = vmatpush.bf16.msra.mxu2 %v2018_v48 }
 0x568   : > { %1569 = vmatpush.bf16.msra.mxu3 %v2026_v49 }
 0x5c2   : > { %v1182_v51 = vpop.xlane.xlu2 %1181 }
 0x5c3   : > { %v1183_v52 = vmul.f32 %v1182_v51, %v2321_v11  ;;  %v2084_v11 = vld [vmem:[%s2735_s8] ss:$0 sm:$0xff] }
 0x5c5   : > { %v1184_v53 = vadd.f32 1e-05, %v1183_v52 }
 0x5c7   : > { %2106 = vrsqrt.f32 %v1184_v53  ;;  %vm1191_vm8 = vweird.f32 %v1184_v53 }
 0x5cd   : > { %v2107_v54 = vpop.eup %2106 }
 0x5ce   : > { %v1186_v55 = vmul.f32 %v2107_v54, %v1184_v53  ;;  %vm1192_vm7 = vweird.f32 %v2107_v54 }
 0x5cf   : > { %vm1193_vm9 = vmor %vm1191_vm8, %vm1192_vm7 }
 0x5d0   : > { %v1187_v56 = vmul.f32 %v2107_v54, %v1186_v55 }
 0x5d2   : > { %v1188_v57 = vmul.f32 0.5, %v1187_v56 }
 0x5d4   : > { %v1189_v58 = vsub.f32 1.5, %v1188_v57 }
 0x5d6   : > { %v1190_v59 = vmul.f32 %v2107_v54, %v1189_v58 }
 0x5d8   : > { %v1194_v62 = vsel %vm1193_vm9, %v2107_v54, %v1190_v59 }
 0x5d9   : > { %v1195_v63 = vmul.f32 %v1194_v62, %v2518_v6  ;;  %v1225_v6 = vperm.slane %v1223_v3, 0 }
 0x5db   : > { %v1200_v1 = vmul.f32 %v2083_v60, %v1195_v63 }
 0x5dd   : > { %v1205_v2 = vadd.f32 %v2084_v11, %v1200_v1 }
 0x5df   : > { %v1206_v0 = vpack.c.bf16 %v1205_v2, %v1205_v2 }
 0x5e1   : > { %1317 = vmatmul.bf16.vlgmr.msra.gmra.mxu0 %v1206_v0  ;;  %1330 = vmatmul.bf16.vlgmr.msra.gmra.mxu1 %v1206_v0 }
 0x65e   : > { %v1318_v8 = vpop.f32.mrf.mxu0  ;;  %v1331_v9 = vpop.f32.mrf.mxu1 }
 0x65f   : > { %v2629_v14 = vadd.f32 %v1318_v8, %v1225_v6  ;;  %v2631_v15 = vadd.f32 %v1331_v9, %v1226_v7 }
 0x661   : > { %v2634_v10 = vmul.f32 0.70710677, %v2629_v14  ;;  %v2637_v16 = vmul.f32 0.70710677, %v2631_v15  ;;  %v1335_v31 = vmul.f32 0.5, %v2629_v14 }
 0x663   : > { %v2646_v19 = vand.u32 2147483647, %v2634_v10  ;;  %v2649_v20 = vand.u32 2147483647, %v2637_v16  ;;  %vm1405_vm2 = vcmp.lt.f32.partialorder %v2634_v10, 0.0  ;;  %vm1406_vm3 = vcmp.lt.f32.partialorder %v2637_v16, 0.0 }
 0x664   : > { %v2085_v10 = vld [vmem:[%s2739_s12] ss:$0 sm:$0xff] }
 0x665   : > { %v1341_v21 = vmul.f32 0.3275911, %v2646_v19  ;;  %v1342_v22 = vmul.f32 0.3275911, %v2649_v20  ;;  %v1393_v55 = vsub.f32 0.0, %v2646_v19  ;;  %v1394_v59 = vsub.f32 0.0, %v2649_v20 }
 0x666   : > { %v1320_v23 = vpop.f32.mrf.mxu0  ;;  %v1333_v24 = vpop.f32.mrf.mxu1 }
 0x667   : > { %v1343_v27 = vadd.f32 1.0, %v1341_v21  ;;  %v1344_v28 = vadd.f32 1.0, %v1342_v22  ;;  %v1395_v63 = vmul.f32 %v1393_v55, %v2646_v19  ;;  %v1396_v2 = vmul.f32 %v1394_v59, %v2649_v20 }
 0x669   : > { %2108 = vrcp.f32 %v1343_v27  ;;  %v1356_v40 = vand.u32 2147483648, %v1343_v27  ;;  %v1354_v43 = vand.u32 2147483647, %v1343_v27  ;;  %v1371_v44 = vand.u32 2147483648, %v1344_v28 }
 0x66a   : > { %2110 = vrcp.f32 %v1344_v28  ;;  %v1369_v46 = vand.u32 2147483647, %v1344_v28  ;;  %vm1350_vm12 = vweird.f32 %v1343_v27  ;;  %vm1365_vm14 = vweird.f32 %v1344_v28 }
 0x66b   : > { %v1357_v50 = vor.u32 1.1754944e-38, %v1356_v40  ;;  %vm1355_vm15 = vcmp.eq.f32.partialorder %v1354_v43, 8.507059e+37  ;;  %v1372_v53 = vor.u32 1.1754944e-38, %v1371_v44  ;;  %v1397_v4 = vmul.f32 1.442695, %v1395_v63 }
 0x66c   : > { %vm1370_vm1 = vcmp.eq.f32.partialorder %v1369_v46, 8.507059e+37  ;;  %v1399_v7 = vmul.f32 1.442695, %v1396_v2 }
 0x66d   : > { %2112 = vpow2.f32 %v1397_v4 }
 0x66e   : > { %2114 = vpow2.f32 %v1399_v7 }
 0x66f   : > { %v2109_v33 = vpop.eup %2108 }
 0x670   : > { %v2111_v34 = vpop.eup %2110  ;;  %v1346_v35 = vmul.f32 %v2109_v33, %v1343_v27  ;;  %vm1351_vm10 = vweird.f32 %v2109_v33 }
 0x671   : > { %v1361_v36 = vmul.f32 %v2111_v34, %v1344_v28  ;;  %vm1366_vm11 = vweird.f32 %v2111_v34  ;;  %vm1352_vm13 = vmor %vm1350_vm12, %vm1351_vm10 }
 0x672   : > { %v1347_v37 = vsub.f32 1.0, %v1346_v35  ;;  %vm1367_vm0 = vmor %vm1365_vm14, %vm1366_vm11 }
 0x673   : > { %v1362_v41 = vsub.f32 1.0, %v1361_v36  ;;  %v2113_v22 = vpop.eup %2112 }
 0x674   : > { %v1348_v42 = vmul.f32 %v2109_v33, %v1347_v37  ;;  %v2115_v24 = vpop.eup %2114 }
 0x675   : > { %v1363_v45 = vmul.f32 %v2111_v34, %v1362_v41 }
 0x676   : > { %v1349_v47 = vadd.f32 %v2109_v33, %v1348_v42 }
 0x677   : > { %v1364_v51 = vadd.f32 %v2111_v34, %v1363_v45 }
 0x678   : > { %v1353_v52 = vsel %vm1352_vm13, %v2109_v33, %v1349_v47 }
 0x679   : > { %v1358_v54 = vsel %vm1355_vm15, %v1357_v50, %v1353_v52  ;;  %v1368_v56 = vsel %vm1367_vm0, %v2111_v34, %v1364_v51  ;;  %v1336_v34 = vmul.f32 0.5, %v2631_v15 }
 0x67a   : > { %v1375_v57 = vmul.f32 1.0614054, %v1358_v54  ;;  %v1373_v58 = vsel %vm1370_vm1, %v1372_v53, %v1368_v56 }
 0x67b   : > { %v1376_v60 = vmul.f32 1.0614054, %v1373_v58 }
 0x67c   : > { %v1377_v62 = vadd.f32 -1.4531521, %v1375_v57 }
 0x67d   : > { %v1378_v11 = vadd.f32 -1.4531521, %v1376_v60 }
 0x67e   : > { %v1379_v1 = vmul.f32 %v1377_v62, %v1358_v54 }
 0x67f   : > { %v1380_v0 = vmul.f32 %v1378_v11, %v1373_v58 }
 0x680   : > { %v1381_v3 = vadd.f32 1.4214138, %v1379_v1 }
 0x681   : > { %v1382_v5 = vadd.f32 1.4214138, %v1380_v0 }
 0x682   : > { %v1383_v6 = vmul.f32 %v1381_v3, %v1358_v54 }
 0x683   : > { %v1384_v8 = vmul.f32 %v1382_v5, %v1373_v58 }
 0x684   : > { %v1385_v9 = vadd.f32 -0.28449672, %v1383_v6 }
 0x685   : > { %v1386_v12 = vadd.f32 -0.28449672, %v1384_v8 }
 0x686   : > { %v1387_v13 = vmul.f32 %v1385_v9, %v1358_v54 }
 0x687   : > { %v1388_v17 = vmul.f32 %v1386_v12, %v1373_v58 }
 0x688   : > { %v1389_v18 = vadd.f32 0.2548296, %v1387_v13 }
 0x689   : > { %v1390_v21 = vadd.f32 0.2548296, %v1388_v17 }
 0x68a   : > { %v1391_v19 = vmul.f32 %v1389_v18, %v1358_v54 }
 0x68b   : > { %v1392_v23 = vmul.f32 %v1390_v21, %v1373_v58 }
 0x68c   : > { %v1401_v20 = vmul.f32 %v2113_v22, %v1391_v19 }
 0x68d   : > { %v1402_v25 = vmul.f32 %v2115_v24, %v1392_v23 }
 0x68e   : > { %v1403_v26 = vsub.f32 1.0, %v1401_v20 }
 0x68f   : > { %v1404_v27 = vsub.f32 1.0, %v1402_v25 }
 0x690   : > { %v1407_v28 = vsub.f32 0.0, %v1403_v26 }
 0x691   : > { %v1408_v29 = vsub.f32 0.0, %v1404_v27 }
 0x692   : > { %v1409_v30 = vsel %vm1405_vm2, %v1407_v28, %v1403_v26 }
 0x693   : > { %v1411_v32 = vadd.f32 1.0, %v1409_v30  ;;  %v1410_v33 = vsel %vm1406_vm3, %v1408_v29, %v1404_v27 }
 0x694   : > { %v1412_v35 = vadd.f32 1.0, %v1410_v33 }
 0x695   : > { %v1413_v36 = vmul.f32 %v1411_v32, %v1335_v31 }
 0x696   : > { %v1414_v37 = vmul.f32 %v1412_v35, %v1336_v34 }
 0x697   : > { %v1415_v38 = vpack.c.bf16 %v1413_v36, %v1413_v36 }
 0x698   : > { %v1416_v39 = vpack.c.bf16 %v1414_v37, %v1414_v37 }
 0x699   : > { %1557 = vmatmul.bf16.vlgmr.msra.gmra.mxu2 %v1415_v38 }
 0x69a   : > { %1570 = vmatmul.bf16.vlgmr.msra.gmra.mxu3 %v1416_v39 }
 0x71c   : > { %v1558_v14 = vpop.f32.mrf.mxu2 }
 0x71d   : > { %v1559_v15 = vadd.f32 %v2085_v10, %v1558_v14  ;;  %v1571_v16 = vpop.f32.mrf.mxu3 }
 0x71f   : > { %v1572_v40 = vadd.f32 %v1571_v16, %v1559_v15 }
 0x721   : > { %v1575_v41 = vadd.f32 %v1572_v40, %v2501_v61 }
 0x723   : > { %1576 = vst [vmem:[%s431_s22] sm:$0xff] %v1575_v41 }
 0x724   : > { %v1560_v42 = vpop.f32.mrf.mxu2 }
 0x725   : > { %2143 = shalt.err (!%p2140_p3)
}
 0x726   : > { %2034 = dma.vmem_to_hbm [thread:$0]  (%p2291_p5), %s1591_s21, 128, %s1593_s0, %s1578_s29   ;;  %v1573_v61 = vpop.f32.mrf.mxu3 }
 0x727 PF: > { %p2040_p4 = scmp.ge.s32.totalorder %s2178_s28, 2  ;;  %s1604_s27 = sand.u32 1, %s2166_s25  }
 0x728   : > { %s1605_s22 = scalar_lea.sflag [#allocation3], %s1604_s27 }
 0x729   : > { %p2037_p7 = pnand %p2040_p4, %p2295_p6 }
 0x72b   : > { %p2038_p8 = pneg %p2037_p7 }
 0x72d   : > { %2161 = dma.done.wait (%p2038_p8), %s1605_s22, 128  }
 0x72e   : > { %2163 = vsyncadd (%p2038_p8), %s1605_s22, 4294967168  ;;  %s2748_s24 = sld [smem:[#allocation5_spill]]  ;;  %p23_p9 = scmp.ge.s32.totalorder %s2278_s14, 4  }
 0x72f   : > { %s2749_s27 = sld [smem:[#allocation6_spill]]  ;;  %s2750_s25 = smov %s2170_s26 }
 0x730   : > { %s2752_s28 = smov %s2278_s14  ;;  %25 = sbr.rel (!%p23_p9) target bundleno = 5 (0x5), region = 107 }
 0x734   : > { %s2751_s26 = smov %s2748_s24 }
 0x735   :  { %1611 = vsyncpa [#allocation3], 1 }
 0x736   :  { %1613 = vsyncpa [#allocation3 + $0x1], 1 }

</bundles_post_ra>
